<compile_context>
chip_gen: v6e
topology: v6e:2x2x1
jax: 0.10.0
libtpu: 0.0.40
codegen_flags: <defaults>
</compile_context>

<pallas_src>
import jax
import jax.numpy as jnp
from jax import lax
from jax.experimental import pallas as pl
from jax.experimental.pallas import tpu as pltpu


def _pearson_self_batched(t):
    """Pearson self-correlation per batch: (B, N, F) -> (B, N, N).

    Matches pearson_correlation(x, x) from the reference: unbiased std
    (correction=1) and a final /F, both folded into a single rsqrt row scale.
    """
    feat = t.shape[-1]
    mean = jnp.mean(t, axis=-1, keepdims=True)
    c = t - mean
    # 1 / (std_unbiased * sqrt(F)): folds the unbiased 1/(F-1) and the Gram's
    # 1/F into one EUP rsqrt -> no vector divides, no extra vmuls on the Gram.
    inv = lax.rsqrt(jnp.sum(c * c, axis=-1, keepdims=True) * (feat / (feat - 1)))
    tn = c * inv
    # Batched Gram, contracting on the last dim (no transpose materialized).
    return jnp.einsum("bnf,bmf->bnm", tn, tn, preferred_element_type=jnp.float32)


def _ln_last(x, scale=1.0, eps=1e-5):
    """nn.LayerNorm over the last dim with default affine params (1, 0).

    `scale` lets callers fold trailing constant scalings (e.g. the final /2)
    into the rsqrt factor for free.
    """
    mean = jnp.mean(x, axis=-1, keepdims=True)
    var = jnp.mean(jnp.square(x - mean), axis=-1, keepdims=True)
    return (x - mean) * (scale * lax.rsqrt(var + eps))


def pcnetwork_kernel(src_ref, wq_ref, out_ref):
    # src_ref: (B, N, F); wq_ref: (F, H) == W_q.weight.T; out_ref: (B*N, N)
    x = src_ref[...].astype(jnp.float32)          # .float() in the reference
    wq = wq_ref[...].astype(jnp.float32)
    B, N, F = x.shape
    H = wq.shape[1]

    # q = dropout(W_q(src)); dropout is identity in eval mode.
    # Leading-dim-only reshapes (layout-safe) keep the matmul 2-D.
    q = jnp.dot(x.reshape(B * N, F), wq,
                preferred_element_type=jnp.float32).reshape(B, N, H)

    # a  = ln(f_correltaion(queries, keys))  -- keys ignored (module bug kept)
    # a1 = ln(f_correltaion(q, k))           -- k ignored (module bug kept)
    a = _ln_last(_pearson_self_batched(x))
    a1 = _ln_last(_pearson_self_batched(q))

    # ln(a + a1) / 2, with the /2 folded into the layernorm rsqrt factor.
    out = _ln_last(a + a1, scale=0.5)             # (B, N, N)

    # Single contiguous 2-D store; only leading dims are merged (layout-safe).
    out_ref[...] = out.reshape(B * N, N)


def pcnetwork_forward(src, wq_t):
    """src: (B, N, F) float32; wq_t: (F, H) float32 (transposed Linear weight)."""
    B, N, F = src.shape
    Fh, H = wq_t.shape
    assert Fh == F

    out2d = pl.pallas_call(
        pcnetwork_kernel,
        out_shape=jax.ShapeDtypeStruct((B * N, N), jnp.float32),
        grid_spec=pltpu.PrefetchScalarGridSpec(
            num_scalar_prefetch=0,
            grid=(1,),  # one step: all batches handled inside the kernel body
            in_specs=[
                pl.BlockSpec((B, N, F), lambda i: (0, 0, 0)),
                pl.BlockSpec((F, H), lambda i: (0, 0)),
            ],
            out_specs=pl.BlockSpec((B * N, N), lambda i: (0, 0)),
        ),
        compiler_params=pltpu.CompilerParams(
            dimension_semantics=("arbitrary",)),
    )(src, wq_t)
    return out2d.reshape(B, N, N)


def pcnetwork_reference(src, wq_t):
    """Pure-JAX reference using the literal torch-style formulation
    (divide-by-std, /features, separate /2) to cross-check the folded kernel."""

    def pearson(t):
        t = t.astype(jnp.float32)
        feat = t.shape[1]
        mean = jnp.mean(t, axis=1, keepdims=True)
        c = t - mean
        std = jnp.sqrt(jnp.sum(c * c, axis=1, keepdims=True) / (feat - 1))
        tn = c / std
        return (tn @ tn.T) / feat

    def ln(x, eps=1e-5):
        m = jnp.mean(x, axis=-1, keepdims=True)
        v = jnp.mean((x - m) ** 2, axis=-1, keepdims=True)
        return (x - m) / jnp.sqrt(v + eps)

    def per_batch(x):
        q = x.astype(jnp.float32) @ wq_t
        a = ln(pearson(x))
        a1 = ln(pearson(q))
        return ln(a + a1) / 2.0

    return jax.vmap(per_batch)(src)


if __name__ == "__main__":
    # Shapes consistent with the module:
    #   key_size = query_size = value_size = F = 16
    #   hidden_size = H = 32, norm_num = N = 8 (sequence length), batch B = 2
    B, N, F, H = 2, 8, 16, 32

    key = jax.random.PRNGKey(0)
    k_src, k_wq, k_wk, k_wv = jax.random.split(key, 4)

    src = jax.random.normal(k_src, (B, N, F), dtype=jnp.float32)

    # Deterministic parameter init (kaiming-uniform-like bound as in nn.Linear).
    bound = 1.0 / (F ** 0.5)
    wq = jax.random.uniform(k_wq, (H, F), minval=-bound, maxval=bound,
                            dtype=jnp.float32)   # nn.Linear W_q weight (H, F)
    wk = jax.random.uniform(k_wk, (H, F), minval=-bound, maxval=bound,
                            dtype=jnp.float32)   # defined; unused (module bug)
    wv = jax.random.uniform(k_wv, (H, F), minval=-bound, maxval=bound,
                            dtype=jnp.float32)   # defined; never called in forward
    wq_t = wq.T                                  # (F, H) for x @ W^T

    out = pcnetwork_forward(src, wq_t)
    out = jax.block_until_ready(out)

    ref = pcnetwork_reference(src, wq_t)
    assert out.shape == (B, N, N)
    assert jnp.allclose(out, ref, atol=1e-4, rtol=1e-4), "mismatch vs reference"

    print("KERNEL_OK")
</pallas_src>

<mosaic_0001>
module attributes {stable_mosaic.version = 11 : i64} {
  func.func @pcnetwork_kernel(%arg0: i32, %arg1: memref<2x8x16xf32, #tpu.memory_space<vmem>>, %arg2: memref<16x32xf32, #tpu.memory_space<vmem>>, %arg3: memref<16x8xf32, #tpu.memory_space<vmem>>) attributes {dimension_semantics = [#tpu.dimension_semantics<arbitrary>], iteration_bounds = array<i64: 1>, scalar_prefetch = 0 : i64, scratch_operands = 0 : i64, tpu.core_type = #tpu.core_type<tc>, window_params = [{pipeline_mode = #tpu.pipeline_mode<synchronous>, transform_indices = @transform_0, window_bounds = array<i64: 2, 8, 16>}, {pipeline_mode = #tpu.pipeline_mode<synchronous>, transform_indices = @transform_1, window_bounds = array<i64: 16, 32>}, {pipeline_mode = #tpu.pipeline_mode<synchronous>, transform_indices = @transform_2, window_bounds = array<i64: 16, 8>}]} {
    %c0 = arith.constant 0 : index
    %c0_0 = arith.constant 0 : index
    %c0_1 = arith.constant 0 : index
    %0 = vector.load %arg1[%c0, %c0_0, %c0_1] : memref<2x8x16xf32, #tpu.memory_space<vmem>>, vector<2x8x16xf32>
    %c0_2 = arith.constant 0 : index
    %c0_3 = arith.constant 0 : index
    %1 = vector.load %arg2[%c0_2, %c0_3] : memref<16x32xf32, #tpu.memory_space<vmem>>, vector<16x32xf32>
    %2 = vector.shape_cast %0 : vector<2x8x16xf32> to vector<16x16xf32>
    %cst = arith.constant dense<0.000000e+00> : vector<16x32xf32>
    %3 = tpu.matmul %2, %1, %cst {dimension_numbers = #tpu.dot_dimension_numbers<[1], [0], [0], [1], [0, 0, 1, 1], [], []>} : vector<16x16xf32>, vector<16x32xf32>, vector<16x32xf32> -> vector<16x32xf32>
    %4 = vector.shape_cast %3 : vector<16x32xf32> to vector<2x8x32xf32>
    %cst_4 = arith.constant dense<0.000000e+00> : vector<2x8xf32>
    %5 = vector.multi_reduction <add>, %0, %cst_4 [2] : vector<2x8x16xf32> to vector<2x8xf32>
    %6 = vector.shape_cast %5 : vector<2x8xf32> to vector<2x8x1xf32>
    %cst_5 = arith.constant 1.600000e+01 : f32
    %7 = vector.broadcast %cst_5 : f32 to vector<2x8x1xf32>
    %8 = arith.divf %6, %7 : vector<2x8x1xf32>
    %9 = vector.broadcast %8 : vector<2x8x1xf32> to vector<2x8x16xf32>
    %10 = arith.subf %0, %9 : vector<2x8x16xf32>
    %11 = arith.mulf %10, %10 : vector<2x8x16xf32>
    %cst_6 = arith.constant dense<0.000000e+00> : vector<2x8xf32>
    %12 = vector.multi_reduction <add>, %11, %cst_6 [2] : vector<2x8x16xf32> to vector<2x8xf32>
    %13 = vector.shape_cast %12 : vector<2x8xf32> to vector<2x8x1xf32>
    %cst_7 = arith.constant 1.06666672 : f32
    %14 = vector.broadcast %cst_7 : f32 to vector<2x8x1xf32>
    %15 = arith.mulf %13, %14 : vector<2x8x1xf32>
    %16 = math.rsqrt %15 : vector<2x8x1xf32>
    %17 = vector.broadcast %16 : vector<2x8x1xf32> to vector<2x8x16xf32>
    %18 = arith.mulf %10, %17 : vector<2x8x16xf32>
    "tpu.trace_start"() <{level = 10 : i32, message = "bnf,bmf->bnm"}> : () -> ()
    %cst_8 = arith.constant dense<0.000000e+00> : vector<2x8x8xf32>
    %19 = tpu.matmul %18, %18, %cst_8 {dimension_numbers = #tpu.dot_dimension_numbers<[2], [2], [1], [1], [0, 0, 0, 1, 1, 1], [0], [0]>} : vector<2x8x16xf32>, vector<2x8x16xf32>, vector<2x8x8xf32> -> vector<2x8x8xf32>
    "tpu.trace_stop"() : () -> ()
    %cst_9 = arith.constant dense<0.000000e+00> : vector<2x8xf32>
    %20 = vector.multi_reduction <add>, %19, %cst_9 [2] : vector<2x8x8xf32> to vector<2x8xf32>
    %21 = vector.shape_cast %20 : vector<2x8xf32> to vector<2x8x1xf32>
    %cst_10 = arith.constant 8.000000e+00 : f32
    %22 = vector.broadcast %cst_10 : f32 to vector<2x8x1xf32>
    %23 = arith.divf %21, %22 : vector<2x8x1xf32>
    %24 = vector.broadcast %23 : vector<2x8x1xf32> to vector<2x8x8xf32>
    %25 = arith.subf %19, %24 : vector<2x8x8xf32>
    %26 = arith.mulf %25, %25 : vector<2x8x8xf32>
    %cst_11 = arith.constant dense<0.000000e+00> : vector<2x8xf32>
    %27 = vector.multi_reduction <add>, %26, %cst_11 [2] : vector<2x8x8xf32> to vector<2x8xf32>
    %28 = vector.shape_cast %27 : vector<2x8xf32> to vector<2x8x1xf32>
    %cst_12 = arith.constant 8.000000e+00 : f32
    %29 = vector.broadcast %cst_12 : f32 to vector<2x8x1xf32>
    %30 = arith.divf %28, %29 : vector<2x8x1xf32>
    %31 = vector.broadcast %23 : vector<2x8x1xf32> to vector<2x8x8xf32>
    %32 = arith.subf %19, %31 : vector<2x8x8xf32>
    %cst_13 = arith.constant 9.99999974E-6 : f32
    %33 = vector.broadcast %cst_13 : f32 to vector<2x8x1xf32>
    %34 = arith.addf %30, %33 : vector<2x8x1xf32>
    %35 = math.rsqrt %34 : vector<2x8x1xf32>
    %cst_14 = arith.constant 1.000000e+00 : f32
    %36 = vector.broadcast %cst_14 : f32 to vector<2x8x1xf32>
    %37 = arith.mulf %36, %35 : vector<2x8x1xf32>
    %38 = vector.broadcast %37 : vector<2x8x1xf32> to vector<2x8x8xf32>
    %39 = arith.mulf %32, %38 : vector<2x8x8xf32>
    %cst_15 = arith.constant dense<0.000000e+00> : vector<2x8xf32>
    %40 = vector.multi_reduction <add>, %4, %cst_15 [2] : vector<2x8x32xf32> to vector<2x8xf32>
    %41 = vector.shape_cast %40 : vector<2x8xf32> to vector<2x8x1xf32>
    %cst_16 = arith.constant 3.200000e+01 : f32
    %42 = vector.broadcast %cst_16 : f32 to vector<2x8x1xf32>
    %43 = arith.divf %41, %42 : vector<2x8x1xf32>
    %44 = vector.broadcast %43 : vector<2x8x1xf32> to vector<2x8x32xf32>
    %45 = arith.subf %4, %44 : vector<2x8x32xf32>
    %46 = arith.mulf %45, %45 : vector<2x8x32xf32>
    %cst_17 = arith.constant dense<0.000000e+00> : vector<2x8xf32>
    %47 = vector.multi_reduction <add>, %46, %cst_17 [2] : vector<2x8x32xf32> to vector<2x8xf32>
    %48 = vector.shape_cast %47 : vector<2x8xf32> to vector<2x8x1xf32>
    %cst_18 = arith.constant 1.03225803 : f32
    %49 = vector.broadcast %cst_18 : f32 to vector<2x8x1xf32>
    %50 = arith.mulf %48, %49 : vector<2x8x1xf32>
    %51 = math.rsqrt %50 : vector<2x8x1xf32>
    %52 = vector.broadcast %51 : vector<2x8x1xf32> to vector<2x8x32xf32>
    %53 = arith.mulf %45, %52 : vector<2x8x32xf32>
    "tpu.trace_start"() <{level = 10 : i32, message = "bnf,bmf->bnm"}> : () -> ()
    %cst_19 = arith.constant dense<0.000000e+00> : vector<2x8x8xf32>
    %54 = tpu.matmul %53, %53, %cst_19 {dimension_numbers = #tpu.dot_dimension_numbers<[2], [2], [1], [1], [0, 0, 0, 1, 1, 1], [0], [0]>} : vector<2x8x32xf32>, vector<2x8x32xf32>, vector<2x8x8xf32> -> vector<2x8x8xf32>
    "tpu.trace_stop"() : () -> ()
    %cst_20 = arith.constant dense<0.000000e+00> : vector<2x8xf32>
    %55 = vector.multi_reduction <add>, %54, %cst_20 [2] : vector<2x8x8xf32> to vector<2x8xf32>
    %56 = vector.shape_cast %55 : vector<2x8xf32> to vector<2x8x1xf32>
    %cst_21 = arith.constant 8.000000e+00 : f32
    %57 = vector.broadcast %cst_21 : f32 to vector<2x8x1xf32>
    %58 = arith.divf %56, %57 : vector<2x8x1xf32>
    %59 = vector.broadcast %58 : vector<2x8x1xf32> to vector<2x8x8xf32>
    %60 = arith.subf %54, %59 : vector<2x8x8xf32>
    %61 = arith.mulf %60, %60 : vector<2x8x8xf32>
    %cst_22 = arith.constant dense<0.000000e+00> : vector<2x8xf32>
    %62 = vector.multi_reduction <add>, %61, %cst_22 [2] : vector<2x8x8xf32> to vector<2x8xf32>
    %63 = vector.shape_cast %62 : vector<2x8xf32> to vector<2x8x1xf32>
    %cst_23 = arith.constant 8.000000e+00 : f32
    %64 = vector.broadcast %cst_23 : f32 to vector<2x8x1xf32>
    %65 = arith.divf %63, %64 : vector<2x8x1xf32>
    %66 = vector.broadcast %58 : vector<2x8x1xf32> to vector<2x8x8xf32>
    %67 = arith.subf %54, %66 : vector<2x8x8xf32>
    %cst_24 = arith.constant 9.99999974E-6 : f32
    %68 = vector.broadcast %cst_24 : f32 to vector<2x8x1xf32>
    %69 = arith.addf %65, %68 : vector<2x8x1xf32>
    %70 = math.rsqrt %69 : vector<2x8x1xf32>
    %cst_25 = arith.constant 1.000000e+00 : f32
    %71 = vector.broadcast %cst_25 : f32 to vector<2x8x1xf32>
    %72 = arith.mulf %71, %70 : vector<2x8x1xf32>
    %73 = vector.broadcast %72 : vector<2x8x1xf32> to vector<2x8x8xf32>
    %74 = arith.mulf %67, %73 : vector<2x8x8xf32>
    %75 = arith.addf %39, %74 : vector<2x8x8xf32>
    %cst_26 = arith.constant dense<0.000000e+00> : vector<2x8xf32>
    %76 = vector.multi_reduction <add>, %75, %cst_26 [2] : vector<2x8x8xf32> to vector<2x8xf32>
    %77 = vector.shape_cast %76 : vector<2x8xf32> to vector<2x8x1xf32>
    %cst_27 = arith.constant 8.000000e+00 : f32
    %78 = vector.broadcast %cst_27 : f32 to vector<2x8x1xf32>
    %79 = arith.divf %77, %78 : vector<2x8x1xf32>
    %80 = vector.broadcast %79 : vector<2x8x1xf32> to vector<2x8x8xf32>
    %81 = arith.subf %75, %80 : vector<2x8x8xf32>
    %82 = arith.mulf %81, %81 : vector<2x8x8xf32>
    %cst_28 = arith.constant dense<0.000000e+00> : vector<2x8xf32>
    %83 = vector.multi_reduction <add>, %82, %cst_28 [2] : vector<2x8x8xf32> to vector<2x8xf32>
    %84 = vector.shape_cast %83 : vector<2x8xf32> to vector<2x8x1xf32>
    %cst_29 = arith.constant 8.000000e+00 : f32
    %85 = vector.broadcast %cst_29 : f32 to vector<2x8x1xf32>
    %86 = arith.divf %84, %85 : vector<2x8x1xf32>
    %87 = vector.broadcast %79 : vector<2x8x1xf32> to vector<2x8x8xf32>
    %88 = arith.subf %75, %87 : vector<2x8x8xf32>
    %cst_30 = arith.constant 9.99999974E-6 : f32
    %89 = vector.broadcast %cst_30 : f32 to vector<2x8x1xf32>
    %90 = arith.addf %86, %89 : vector<2x8x1xf32>
    %91 = math.rsqrt %90 : vector<2x8x1xf32>
    %cst_31 = arith.constant 5.000000e-01 : f32
    %92 = vector.broadcast %cst_31 : f32 to vector<2x8x1xf32>
    %93 = arith.mulf %92, %91 : vector<2x8x1xf32>
    %94 = vector.broadcast %93 : vector<2x8x1xf32> to vector<2x8x8xf32>
    %95 = arith.mulf %88, %94 : vector<2x8x8xf32>
    %96 = vector.shape_cast %95 : vector<2x8x8xf32> to vector<16x8xf32>
    %c0_32 = arith.constant 0 : index
    %c0_33 = arith.constant 0 : index
    %97 = vector.load %arg3[%c0_32, %c0_33] : memref<16x8xf32, #tpu.memory_space<vmem>>, vector<16x8xf32>
    tpu.vector_store %arg3[%c0_32, %c0_33], %96 {strides = array<i32>} : memref<16x8xf32, #tpu.memory_space<vmem>>, vector<16x8xf32>,
    return
  }
  func.func @transform_0(%arg0: i32) -> (i32, i32, i32) {
    %c0_i32 = arith.constant 0 : i32
    %c0_i32_0 = arith.constant 0 : i32
    %c0_i32_1 = arith.constant 0 : i32
    %c0_i32_2 = arith.constant 0 : i32
    return %c0_i32, %c0_i32_0, %c0_i32_1 : i32, i32, i32
  }
  func.func @transform_1(%arg0: i32) -> (i32, i32) {
    %c0_i32 = arith.constant 0 : i32
    %c0_i32_0 = arith.constant 0 : i32
    %c0_i32_1 = arith.constant 0 : i32
    return %c0_i32, %c0_i32_0 : i32, i32
  }
  func.func @transform_2(%arg0: i32) -> (i32, i32) {
    %c0_i32 = arith.constant 0 : i32
    %c0_i32_0 = arith.constant 0 : i32
    %c0_i32_1 = arith.constant 0 : i32
    return %c0_i32, %c0_i32_0 : i32, i32
  }
}

</mosaic_0001>

<bundles_post_ra>
// kernel: tpu_custom_call.1
= control target key start
LH: loop header
LB: loop body
LE: loop exit
PB: predicated region body
PF: predicated region fallthrough
CT: control target
= control target key end

     0   :  { %7 = vsyncpa [#allocation3], 0  ;;  %s748_s0 = inlined_call_operand.hbm [shape: f32[2,8,16], index: 0, kind: input, shape index: {}]   ;;  %s749_s1 = inlined_call_operand.hbm [shape: f32[16,32], index: 1, kind: input, shape index: {}]   ;;  %s750_s2 = inlined_call_operand.vmem [shape: f32[16,8], index: 2, kind: output, shape index: {}]  }
   0x1   :  { %8 = vsyncpa [#allocation5], 0  ;;  %s679_s9 = smov [#allocation2]  }
   0x2   :  { %s14_s10 = sshll.u32 %s679_s9, 4  ;;  %s15_s10 = int_to_ptr.vmem [resolvable:$true] %s14_s10 }
   0x3   :  { %s643_s11 = scalar_lea.vmem %s15_s10, 256  ;;  %p648_p1 = scmp.lt.s32.totalorder %s15_s10, %s15_s10 }
   0x4   :  { %p644_p0 = scmp.ne.s32.totalorder %s15_s10, %s643_s11  ;;  %p649_p2 = scmp.lt.s32.totalorder %s643_s11, %s643_s11 }
   0x6   :  { %p650_p3 = por %p649_p2, %p648_p1 }
   0x8   :  { %p651_p4 = pnand %p650_p3, %p644_p0 }
   0xa   :  { %654 = shalt.err (!%p651_p4)
}
   0xb   :  { %s680_s12 = smov 128   ;;  %s681_s13 = smov 8  }
   0xc   :  { %20 = dma.hbm_to_vmem [thread:$0]  %s748_s0, 256, %s15_s10, [#allocation3], %s680_s12, %s680_s12, %s681_s13  }
   0xd   :  { %s682_s16 = smov [#allocation4]  }
   0xe   :  { %s26_s17 = sshll.u32 %s682_s16, 4  ;;  %s27_s17 = int_to_ptr.vmem [resolvable:$true] %s26_s17 }
   0xf   :  { %s663_s18 = scalar_lea.vmem %s27_s17, 256  ;;  %p668_p6 = scmp.lt.s32.totalorder %s27_s17, %s27_s17 }
  0x10   :  { %p664_p5 = scmp.ne.s32.totalorder %s27_s17, %s663_s18  ;;  %p669_p7 = scmp.lt.s32.totalorder %s663_s18, %s663_s18 }
  0x12   :  { %p670_p8 = por %p669_p7, %p668_p6 }
  0x14   :  { %p671_p9 = pnand %p670_p8, %p664_p5 }
  0x16   :  { %674 = shalt.err (!%p671_p9)
}
  0x17   :  { %32 = dma.hbm_to_vmem [thread:$0]  %s749_s1, 256, %s27_s17, [#allocation5], %s680_s12, %s680_s12, %s681_s13  }
  0x18   :  { %675 = dma.done.wait [#allocation3], 256  }
  0x19   :  { %676 = vsyncadd [#allocation3], 4294967040 }
  0x1a   :  { %677 = dma.done.wait [#allocation5], 256  }
  0x1b   :  { %678 = vsyncadd [#allocation5], 4294967040  ;;  %vm43_vm0 = vcmask 130048   ;;  %v42_v0 = vld [vmem:[#allocation4 + $0x8] sm:$0xff]  ;;  %v39_v1 = vld [vmem:[#allocation2] sm:$0xff]  ;;  %v683_v11 = vmov 0.0  }
  0x1c   :  { %v41_v2 = vld [vmem:[#allocation4] sm:$0xff]  ;;  %582 = vmatprep.subr.mxu0 %v42_v0  ;;  %v125_v3 = vsel %vm43_vm0, %v39_v1, 0.0  ;;  %586 = vmatprep.mubr.msk.f32.mxu0 %vm43_vm0, %v39_v1  ;;  %v40_v4 = vld [vmem:[#allocation2 + $0x8] sm:$0xff]  ;;  %vm684_vm1 = vmmov 0   ;;  %vm324_vm2 = vcmask 261120   ;;  %vm296_vm3 = vcmask 64512  }
  0x1d   :  { %583 = vmatpush3.msra.mxu0 %v42_v0  ;;  %126 = vadd.xlane.f32.xlu0 %v125_v3  ;;  %v128_v5 = vsel %vm43_vm0, %v40_v4, 0.0 }
  0x1e   :  { %584 = vmatprep.subr.mxu0 %v41_v2  ;;  %589 = vmatprep.subr.mxu1 %v683_v11 }
  0x1f   :  { %585 = vmatpush3.msra.mxu0 %v41_v2  ;;  %591 = vmatprep.mubr.msk.f32.mxu1 %vm684_vm1, %v683_v11 }
  0x20   :  { %587 = vmatmul.mubr.msk.f32.vlgmr.msra.gmra.mxu0 %vm43_vm0, %v40_v4  ;;  %594 = vmatprep.subr.mxu0 %v683_v11 }
  0x21   :  { %129 = vadd.xlane.f32.xlu0 %v128_v5  ;;  %596 = vmatprep.mubr.msk.f32.mxu0 %vm684_vm1, %v683_v11 }
  0xa6   :  { %v127_v6 = vpop.xlane.xlu0 %126 }
  0xa7   :  { %v132_v7 = vmul.f32 0.0625, %v127_v6 }
  0xa9   :  { %v134_v8 = vsub.f32 %v39_v1, %v132_v7 }
  0xaa   :  { %v130_v12 = vpop.xlane.xlu0 %129 }
  0xab   :  { %v136_v9 = vmul.f32 %v134_v8, %v134_v8  ;;  %v133_v13 = vmul.f32 0.0625, %v130_v12 }
  0xad   :  { %v138_v10 = vsel %vm43_vm0, %v136_v9, 0.0  ;;  %v135_v15 = vsub.f32 %v40_v4, %v133_v13 }
  0xae   :  { %139 = vadd.xlane.f32.xlu0 %v138_v10 }
  0xaf   :  { %v137_v18 = vmul.f32 %v135_v15, %v135_v15 }
  0xb1   :  { %v141_v20 = vsel %vm43_vm0, %v137_v18, 0.0 }
  0xe0   :  { %v588_v14 = vpop.f32.mrf.mxu0 }
  0xe1   :  { %v328_v19 = vsel %vm324_vm2, %v588_v14, 0.0 }
  0xe2   :  { %v116_v16 = vpop.f32.mrf.mxu0 }
  0xe3   :  { %v325_v17 = vsel %vm324_vm2, %v116_v16, 0.0 }
  0xe4   :  { %326 = vadd.xlane.f32.xlu1 %v325_v17 }
  0xe8   :  { %329 = vadd.xlane.f32.xlu1 %v328_v19 }
  0xec   :  { %142 = vadd.xlane.f32.xlu1 %v141_v20 }
 0x137   :  { %v140_v21 = vpop.xlane.xlu0 %139 }
 0x138   :  { %v144_v22 = vmul.f32 1.0666667, %v140_v21 }
 0x13a   :  { %615 = vrsqrt.f32 %v144_v22 }
 0x147   :  { %v616_v23 = vpop.eup %615 }
 0x148   :  { %v148_v24 = vmul.f32 %v616_v23, %v134_v8 }
 0x14a   :  { %590 = vmatpush3.xpose.msk.msra.mxu1 %vm43_vm0, %v148_v24 }
 0x14b   :  { %599 = vmatprep.subr.mxu1 %v683_v11 }
 0x14d   :  { %592 = vmatmul.mubr.msk.f32.vlgmr.msra.gmra.mxu1 %vm43_vm0, %v148_v24 }
 0x14e   :  { %601 = vmatprep.mubr.msk.f32.mxu1 %vm684_vm1, %v683_v11 }
 0x16d   :  { %v327_v25 = vpop.xlane.xlu1 %326 }
 0x16e   :  { %v332_v26 = vmul.f32 0.03125, %v327_v25 }
 0x170   :  { %v334_v27 = vsub.f32 %v116_v16, %v332_v26 }
 0x171   :  { %v330_v28 = vpop.xlane.xlu1 %329 }
 0x172   :  { %v333_v29 = vmul.f32 0.03125, %v330_v28  ;;  %v336_v30 = vmul.f32 %v334_v27, %v334_v27 }
 0x174   :  { %v335_v31 = vsub.f32 %v588_v14, %v333_v29  ;;  %v338_v32 = vsel %vm324_vm2, %v336_v30, 0.0 }
 0x175   :  { %339 = vadd.xlane.f32.xlu0 %v338_v32  ;;  %v143_v33 = vpop.xlane.xlu1 %142 }
 0x176   :  { %v145_v34 = vmul.f32 1.0666667, %v143_v33  ;;  %v337_v35 = vmul.f32 %v335_v31, %v335_v31 }
 0x178   :  { %617 = vrsqrt.f32 %v145_v34  ;;  %v341_v36 = vsel %vm324_vm2, %v337_v35, 0.0 }
 0x179   :  { %342 = vadd.xlane.f32.xlu1 %v341_v36 }
 0x185   :  { %v618_v37 = vpop.eup %617 }
 0x186   :  { %v149_v38 = vmul.f32 %v618_v37, %v135_v15 }
 0x188   :  { %595 = vmatpush3.xpose.msk.msra.mxu0 %vm43_vm0, %v149_v38 }
 0x189   :  { %604 = vmatprep.subr.mxu0 %v683_v11 }
 0x18b   :  { %597 = vmatmul.mubr.msk.f32.vlgmr.msra.gmra.mxu0 %vm43_vm0, %v149_v38 }
 0x18c   :  { %606 = vmatprep.mubr.msk.f32.mxu0 %vm684_vm1, %v683_v11 }
 0x1fe   :  { %v340_v39 = vpop.xlane.xlu0 %339 }
 0x1ff   :  { %v344_v40 = vmul.f32 1.032258, %v340_v39 }
 0x201   :  { %619 = vrsqrt.f32 %v344_v40 }
 0x202   :  { %v343_v41 = vpop.xlane.xlu1 %342 }
 0x203   :  { %v345_v42 = vmul.f32 1.032258, %v343_v41 }
 0x205   :  { %621 = vrsqrt.f32 %v345_v42 }
 0x20d   :  { %v219_v43 = vpop.f32.mrf.mxu1 }
 0x20e   :  { %v620_v44 = vpop.eup %619  ;;  %v297_v45 = vsel %vm296_vm3, %v219_v43, 0.0 }
 0x20f   :  { %298 = vadd.xlane.f32.xlu0 %v297_v45  ;;  %v348_v46 = vmul.f32 %v620_v44, %v334_v27  ;;  %v593_v47 = vpop.f32.mrf.mxu1 }
 0x211   :  { %600 = vmatpush3.xpose.msk.msra.mxu1 %vm324_vm2, %v348_v46 }
 0x212   :  { %v622_v48 = vpop.eup %621 }
 0x213   :  { %v349_v49 = vmul.f32 %v622_v48, %v335_v31 }
 0x214   :  { %602 = vmatmul.mubr.msk.f32.vlgmr.msra.gmra.mxu1 %vm324_vm2, %v348_v46 }
 0x215   :  { %605 = vmatpush3.xpose.msk.msra.mxu0 %vm324_vm2, %v349_v49 }
 0x218   :  { %607 = vmatmul.mubr.msk.f32.vlgmr.msra.gmra.mxu0 %vm324_vm2, %v349_v49 }
 0x24b   :  { %v292_v50 = vpop.f32.mrf.mxu0 }
 0x24c   :  { %v300_v51 = vsel %vm296_vm3, %v292_v50, 0.0 }
 0x24d   :  { %301 = vadd.xlane.f32.xlu1 %v300_v51  ;;  %v598_v52 = vpop.f32.mrf.mxu0 }
 0x298   :  { %v299_v53 = vpop.xlane.xlu0 %298 }
 0x299   :  { %v304_v54 = vmul.f32 0.125, %v299_v53 }
 0x29b   :  { %v306_v55 = vsub.f32 %v219_v43, %v304_v54 }
 0x29d   :  { %v308_v58 = vmul.f32 %v306_v55, %v306_v55 }
 0x29f   :  { %v310_v0 = vsel %vm296_vm3, %v308_v58, 0.0 }
 0x2d4   :  { %v419_v56 = vpop.f32.mrf.mxu1 }
 0x2d5   :  { %v496_v57 = vsel %vm296_vm3, %v419_v56, 0.0 }
 0x2d6   :  { %497 = vadd.xlane.f32.xlu0 %v496_v57  ;;  %v603_v59 = vpop.f32.mrf.mxu1  ;;  %v302_v60 = vpop.xlane.xlu1 %301 }
 0x2d7   :  { %v305_v61 = vmul.f32 0.125, %v302_v60 }
 0x2d8   :  { %v492_v62 = vpop.f32.mrf.mxu0 }
 0x2d9   :  { %v307_v63 = vsub.f32 %v292_v50, %v305_v61  ;;  %v499_v1 = vsel %vm296_vm3, %v492_v62, 0.0 }
 0x2da   :  { %311 = vadd.xlane.f32.xlu0 %v310_v0  ;;  %500 = vadd.xlane.f32.xlu1 %v499_v1  ;;  %v608_v2 = vpop.f32.mrf.mxu0 }
 0x2db   :  { %v309_v3 = vmul.f32 %v307_v63, %v307_v63 }
 0x2dd   :  { %v313_v4 = vsel %vm296_vm3, %v309_v3, 0.0 }
 0x2de   :  { %314 = vadd.xlane.f32.xlu1 %v313_v4 }
 0x35f   :  { %v498_v5 = vpop.xlane.xlu0 %497 }
 0x360   :  { %v502_v6 = vmul.f32 0.125, %v498_v5 }
 0x362   :  { %v504_v7 = vsub.f32 %v419_v56, %v502_v6 }
 0x363   :  { %v501_v8 = vpop.xlane.xlu1 %500  ;;  %v312_v15 = vpop.xlane.xlu0 %311 }
 0x364   :  { %v503_v9 = vmul.f32 0.125, %v501_v8  ;;  %v506_v10 = vmul.f32 %v504_v7, %v504_v7  ;;  %v316_v16 = vmul.f32 0.125, %v312_v15 }
 0x366   :  { %v505_v11 = vsub.f32 %v492_v62, %v503_v9  ;;  %v508_v12 = vsel %vm296_vm3, %v506_v10, 0.0  ;;  %v318_v18 = vadd.f32 1e-05, %v316_v16 }
 0x367   :  { %509 = vadd.xlane.f32.xlu0 %v508_v12  ;;  %v315_v17 = vpop.xlane.xlu1 %314 }
 0x368   :  { %v507_v13 = vmul.f32 %v505_v11, %v505_v11  ;;  %v317_v19 = vmul.f32 0.125, %v315_v17  ;;  %623 = vrsqrt.f32 %v318_v18 }
 0x36a   :  { %v511_v14 = vsel %vm296_vm3, %v507_v13, 0.0  ;;  %v319_v22 = vadd.f32 1e-05, %v317_v19 }
 0x36b   :  { %512 = vadd.xlane.f32.xlu1 %v511_v14 }
 0x375   :  { %v624_v27 = vpop.eup %623 }
 0x376   :  { %v322_v29 = vmul.f32 %v624_v27, %v306_v55 }
 0x3f0   :  { %v510_v20 = vpop.xlane.xlu0 %509 }
 0x3f1   :  { %v514_v21 = vmul.f32 0.125, %v510_v20 }
 0x3f3   :  { %v516_v23 = vadd.f32 1e-05, %v514_v21 }
 0x3f4   :  { %v513_v24 = vpop.xlane.xlu1 %512 }
 0x3f5   :  { %625 = vrsqrt.f32 %v516_v23  ;;  %v515_v25 = vmul.f32 0.125, %v513_v24 }
 0x3f6   :  { %627 = vrsqrt.f32 %v319_v22 }
 0x3f7   :  { %v517_v26 = vadd.f32 1e-05, %v515_v25 }
 0x3f9   :  { %629 = vrsqrt.f32 %v517_v26 }
 0x402   :  { %v626_v28 = vpop.eup %625 }
 0x403   :  { %v520_v30 = vmul.f32 %v626_v28, %v504_v7  ;;  %v628_v31 = vpop.eup %627 }
 0x404   :  { %v323_v35 = vmul.f32 %v628_v31, %v307_v63 }
 0x405   :  { %v522_v32 = vadd.f32 %v520_v30, %v322_v29 }
 0x406   :  { %v630_v33 = vpop.eup %629 }
 0x407   :  { %v524_v34 = vsel %vm296_vm3, %v522_v32, 0.0  ;;  %v521_v36 = vmul.f32 %v630_v33, %v505_v11 }
 0x408   :  { %525 = vadd.xlane.f32.xlu0 %v524_v34 }
 0x409   :  { %v523_v37 = vadd.f32 %v521_v36, %v323_v35 }
 0x40b   :  { %v527_v38 = vsel %vm296_vm3, %v523_v37, 0.0 }
 0x40c   :  { %528 = vadd.xlane.f32.xlu1 %v527_v38 }
 0x491   :  { %v526_v39 = vpop.xlane.xlu0 %525 }
 0x492   :  { %v530_v40 = vmul.f32 0.125, %v526_v39 }
 0x494   :  { %v532_v41 = vsub.f32 %v522_v32, %v530_v40 }
 0x495   :  { %v529_v42 = vpop.xlane.xlu1 %528 }
 0x496   :  { %v531_v43 = vmul.f32 0.125, %v529_v42  ;;  %v534_v44 = vmul.f32 %v532_v41, %v532_v41 }
 0x498   :  { %v533_v45 = vsub.f32 %v523_v37, %v531_v43  ;;  %v536_v46 = vsel %vm296_vm3, %v534_v44, 0.0 }
 0x499   :  { %537 = vadd.xlane.f32.xlu0 %v536_v46 }
 0x49a   :  { %v535_v47 = vmul.f32 %v533_v45, %v533_v45 }
 0x49c   :  { %v539_v48 = vsel %vm296_vm3, %v535_v47, 0.0 }
 0x49d   :  { %540 = vadd.xlane.f32.xlu1 %v539_v48 }
 0x522   :  { %v538_v49 = vpop.xlane.xlu0 %537 }
 0x523   :  { %v542_v50 = vmul.f32 0.125, %v538_v49 }
 0x525   :  { %v544_v51 = vadd.f32 1e-05, %v542_v50 }
 0x526   :  { %v541_v52 = vpop.xlane.xlu1 %540 }
 0x527   :  { %631 = vrsqrt.f32 %v544_v51  ;;  %v543_v53 = vmul.f32 0.125, %v541_v52 }
 0x529   :  { %v545_v54 = vadd.f32 1e-05, %v543_v53 }
 0x52b   :  { %633 = vrsqrt.f32 %v545_v54 }
 0x534   :  { %v632_v55 = vpop.eup %631 }
 0x535   :  { %v548_v56 = vmul.f32 0.5, %v632_v55 }
 0x537   :  { %v550_v57 = vmul.f32 %v548_v56, %v532_v41 }
 0x538   :  { %v634_v58 = vpop.eup %633 }
 0x539   :  { %552 = vst.msk [vmem:[%s750_s2] sm:$0xff] %vm296_vm3, %v550_v57  ;;  %v549_v59 = vmul.f32 0.5, %v634_v58 }
 0x53b   :  { %v551_v60 = vmul.f32 %v549_v59, %v533_v45 }
 0x53d   :  { %553 = vst.msk [vmem:[%s750_s2 + $0x8] sm:$0xff] %vm296_vm3, %v551_v60 }
 0x53e   :  { %558 = vsyncpa [#allocation3], 1 }
 0x53f   :  { %559 = vsyncpa [#allocation5], 1 }

</bundles_post_ra>
